<compile_context>
chip_gen: v7x
topology: tpu7x:2x2x1
jax: 0.10.0
libtpu: 0.0.40
codegen_flags: <defaults>
</compile_context>

<pallas_src>
import functools

import jax
import jax.numpy as jnp
from jax import lax
from jax.experimental import pallas as pl
from jax.experimental.pallas import tpu as pltpu

_LANES = 128


def _round_up(x, m):
    return ((x + m - 1) // m) * m


def _lovasz_tile_kernel(gts_ref, err_ref, gt_ref, loss_ref,
                        tri_ref, low_ref, carry_ref, *, activation, n_valid):
    """Processes one (TILE_R, 128) tile of the globally sorted (err, gt)."""
    i = pl.program_id(0)
    tile_r, c = err_ref.shape

    @pl.when(i == 0)
    def _init():
        # Hoisted constants: 128x128 upper-tri (in-lane cumsum) and
        # TILE_RxTILE_R strict-lower (exclusive in-tile row carries).
        lj = lax.broadcasted_iota(jnp.int32, (c, c), 0)
        li = lax.broadcasted_iota(jnp.int32, (c, c), 1)
        tri_ref[...] = (lj <= li).astype(jnp.bfloat16)
        rj = lax.broadcasted_iota(jnp.int32, (tile_r, tile_r), 1)
        ri = lax.broadcasted_iota(jnp.int32, (tile_r, tile_r), 0)
        low_ref[...] = (rj < ri).astype(jnp.bfloat16)
        carry_ref[0] = 0.0
        loss_ref[...] = jnp.zeros_like(loss_ref)

    gts = gts_ref[...]                         # (1,1) f32 total positives
    err = err_ref[...]                         # (tile_r,128) f32, sorted desc
    gt_bf = gt_ref[...]                        # (tile_r,128) bf16 in {0,1}
    gt_f = gt_bf.astype(jnp.float32)

    # ---- hierarchical inclusive cumsum of gt over the global flat order ----
    cs_in = jnp.dot(gt_bf, tri_ref[...], preferred_element_type=jnp.float32)
    row_tot = cs_in[:, c - 1:c]                # (tile_r,1) per-row gt counts
    row_carry = jnp.dot(low_ref[...], row_tot.astype(jnp.bfloat16),
                        preferred_element_type=jnp.float32)  # exclusive, in-tile
    carry_in = carry_ref[0]                    # exclusive carry from prior tiles
    cs_gt = cs_in + row_carry + carry_in       # inclusive cumsum(gt), global

    # ---- global 1-based flat positions (int32; f32 only for divisions) -----
    # TODO(synk): f32 counts/positions are integer-exact only up to 2^24
    # (~16.7M elements); split into tile_base + local offset beyond that.
    base = i * (tile_r * c)
    pos1_i = (base
              + lax.broadcasted_iota(jnp.int32, (tile_r, c), 0) * c
              + lax.broadcasted_iota(jnp.int32, (tile_r, c), 1) + 1)
    pos1 = pos1_i.astype(jnp.float32)

    # jaccard[k] = 1 - (gts - cumsum(gt)[k]) / (gts + cumsum(1-gt)[k])
    #            = 1 - (gts - cs_gt) / (gts + pos1 - cs_gt)
    union = gts + pos1 - cs_gt                 # >= 1 for binary labels
    jaccard = 1.0 - (gts - cs_gt) / union

    # prev[k] = jaccard[k-1] (prev[0] = 0), recomputed elementwise from the
    # exclusive cumsum -- no shift / roll / extra matmul.
    cs_prev = cs_gt - gt_f
    denom_prev = gts + (pos1 - 1.0) - cs_prev
    prev = jnp.where(denom_prev > 0.0, 1.0 - (gts - cs_prev) / denom_prev, 0.0)
    grad = jaccard - prev

    if activation == 'relu':
        act = jnp.maximum(err, 0.0)
    else:
        # elu1p: elu(err + 1); Taylor branch near 0 for accuracy without expm1.
        xp1 = err + 1.0
        em1 = jnp.where(xp1 > -1e-3, xp1 + 0.5 * xp1 * xp1, jnp.exp(xp1) - 1.0)
        act = jnp.where(xp1 > 0.0, xp1, em1)

    # zero out the padded tail (if any) before the reduction
    act = jnp.where(pos1_i <= n_valid, act, 0.0)

    loss_ref[...] += jnp.sum(act * grad)
    carry_ref[0] = carry_in + jnp.sum(row_tot)


def lovasz_loss(logits, labels, activation='relu', max_tile_rows=512):
    assert activation in ('relu', 'elu1p'), f'Invalid activation: {activation}'
    logits = jnp.asarray(logits, jnp.float32).reshape(-1)
    labels = jnp.asarray(labels, jnp.float32).reshape(-1)
    n = logits.shape[0]
    if n == 0:
        return jnp.sum(logits) * 0.0

    # Hinge errors + descending key/value sort in plain JAX (XLA fuses the
    # elementwise prep into the sort).
    # TODO(synk): the descending sort has no clean Pallas TPU primitive; it is
    # done with lax.sort_key_val between the prep and the Pallas kernel.
    signs = 2.0 * labels - 1.0
    errors = 1.0 - logits * signs
    neg_err_sorted, gt_sorted = lax.sort_key_val(-errors, labels)
    err_sorted = -neg_err_sorted

    rows = -(-n // _LANES)
    tile_r = _round_up(min(max_tile_rows, _round_up(rows, 8)), 8)
    total_rows = _round_up(rows, tile_r)
    num_tiles = total_rows // tile_r

    # Pad (after the sort) so the grid is made of full tiles; padded entries
    # carry gt = 0 and are masked inside the kernel, so the loss is unchanged.
    pad = total_rows * _LANES - n
    if pad:
        err_sorted = jnp.concatenate(
            [err_sorted, jnp.zeros((pad,), jnp.float32)])
        gt_sorted = jnp.concatenate(
            [gt_sorted, jnp.zeros((pad,), jnp.float32)])

    err2 = err_sorted.reshape(total_rows, _LANES)
    gt2 = gt_sorted.astype(jnp.bfloat16).reshape(total_rows, _LANES)  # 0/1 exact
    gts = jnp.sum(labels, dtype=jnp.float32).reshape(1, 1)

    kernel = functools.partial(
        _lovasz_tile_kernel, activation=activation, n_valid=n)
    loss = pl.pallas_call(
        kernel,
        out_shape=jax.ShapeDtypeStruct((1, 1), jnp.float32),
        grid=(num_tiles,),
        in_specs=[pl.BlockSpec((1, 1), lambda i: (0, 0)),
                  pl.BlockSpec((tile_r, _LANES), lambda i: (i, 0)),
                  pl.BlockSpec((tile_r, _LANES), lambda i: (i, 0))],
        out_specs=pl.BlockSpec((1, 1), lambda i: (0, 0)),
        scratch_shapes=[pltpu.VMEM((_LANES, _LANES), jnp.bfloat16),
                        pltpu.VMEM((tile_r, tile_r), jnp.bfloat16),
                        pltpu.SMEM((1,), jnp.float32)],
        compiler_params=pltpu.CompilerParams(
            dimension_semantics=("arbitrary",)),
    )(gts, err2, gt2)
    return loss[0, 0]


def _reference_lovasz(logits, labels, activation='relu'):
    """Pure-JAX reference mirroring the PyTorch forward, for sanity checking."""
    logits = jnp.asarray(logits, jnp.float32).reshape(-1)
    labels = jnp.asarray(labels, jnp.float32).reshape(-1)
    signs = 2.0 * labels - 1.0
    errors = 1.0 - logits * signs
    perm = jnp.argsort(-errors)
    errors_sorted = errors[perm]
    gt_sorted = labels[perm]
    gts = gt_sorted.sum()
    intersection = gts - jnp.cumsum(gt_sorted)
    union = gts + jnp.cumsum(1.0 - gt_sorted)
    jaccard = 1.0 - intersection / union
    jaccard = jnp.concatenate([jaccard[:1], jaccard[1:] - jaccard[:-1]])
    if activation == 'relu':
        act = jnp.maximum(errors_sorted, 0.0)
    else:
        act = jax.nn.elu(errors_sorted + 1.0)
    return jnp.dot(act, jaccard)


if __name__ == "__main__":
    key = jax.random.PRNGKey(0)
    cases = [
        (512, 'relu', 512),      # single tile
        (512, 'elu1p', 512),
        (1000, 'relu', 512),     # single tile + padded tail
        (1000, 'elu1p', 512),
        (3000, 'relu', 8),       # multi-tile carry path + padded tail
        (3000, 'elu1p', 8),
        (4096, 'relu', 8),       # multi-tile, exact fit (4 grid steps)
        (4096, 'elu1p', 8),
    ]
    for n, act, max_rows in cases:
        key, k1, k2 = jax.random.split(key, 3)
        logits = jax.random.normal(k1, (n,), dtype=jnp.float32)
        labels = (jax.random.uniform(k2, (n,)) > 0.5).astype(jnp.float32)

        loss = lovasz_loss(logits, labels, activation=act,
                           max_tile_rows=max_rows)
        jax.block_until_ready(loss)

        ref = _reference_lovasz(logits, labels, activation=act)
        assert jnp.allclose(loss, ref, rtol=1e-4, atol=1e-5), \
            (n, act, max_rows, float(loss), float(ref))

    print("KERNEL_OK")
</pallas_src>

<mosaic_0001>
module attributes {stable_mosaic.version = 11 : i64} {
  func.func @_lovasz_tile_kernel(%arg0: i32, %arg1: memref<1x1xf32, #tpu.memory_space<vmem>>, %arg2: memref<8x128xf32, #tpu.memory_space<vmem>>, %arg3: memref<8x128xbf16, #tpu.memory_space<vmem>>, %arg4: memref<1x1xf32, #tpu.memory_space<vmem>>, %arg5: memref<128x128xbf16, #tpu.memory_space<vmem>>, %arg6: memref<8x8xbf16, #tpu.memory_space<vmem>>, %arg7: memref<1xf32, #tpu.memory_space<smem>>) attributes {dimension_semantics = [#tpu.dimension_semantics<arbitrary>], iteration_bounds = array<i64: 1>, scalar_prefetch = 0 : i64, scratch_operands = 3 : i64, tpu.core_type = #tpu.core_type<tc>, window_params = [{pipeline_mode = #tpu.pipeline_mode<synchronous>, transform_indices = @transform_0, window_bounds = array<i64: 1, 1>}, {transform_indices = @transform_1, window_bounds = array<i64: 8, 128>}, {transform_indices = @transform_2, window_bounds = array<i64: 8, 128>}, {pipeline_mode = #tpu.pipeline_mode<synchronous>, transform_indices = @transform_3, window_bounds = array<i64: 1, 1>}]} {
    %c0_i32 = arith.constant 0 : i32
    %0 = arith.cmpi eq, %arg0, %c0_i32 : i32
    %1 = arith.extui %0 : i1 to i32
    %c0_i32_0 = arith.constant 0 : i32
    %2 = arith.cmpi ne, %1, %c0_i32_0 : i32
    scf.if %2 {
      %74 = tpu.iota {dimensions = array<i32: 0>} : vector<128x128xi32>
      %75 = tpu.iota {dimensions = array<i32: 1>} : vector<128x128xi32>
      %76 = arith.cmpi sle, %74, %75 : vector<128x128xi32>
      %77 = arith.extui %76 : vector<128x128xi1> to vector<128x128xi32>
      %78 = arith.sitofp %77 : vector<128x128xi32> to vector<128x128xf32>
      %79 = arith.truncf %78 : vector<128x128xf32> to vector<128x128xbf16>
      %c0_26 = arith.constant 0 : index
      %c0_27 = arith.constant 0 : index
      %80 = vector.load %arg5[%c0_26, %c0_27] : memref<128x128xbf16, #tpu.memory_space<vmem>>, vector<128x128xbf16>
      tpu.vector_store %arg5[%c0_26, %c0_27], %79 {strides = array<i32>} : memref<128x128xbf16, #tpu.memory_space<vmem>>, vector<128x128xbf16>,
      %81 = tpu.iota {dimensions = array<i32: 1>} : vector<8x8xi32>
      %82 = tpu.iota {dimensions = array<i32: 0>} : vector<8x8xi32>
      %83 = arith.cmpi slt, %81, %82 : vector<8x8xi32>
      %84 = arith.extui %83 : vector<8x8xi1> to vector<8x8xi32>
      %85 = arith.sitofp %84 : vector<8x8xi32> to vector<8x8xf32>
      %86 = arith.truncf %85 : vector<8x8xf32> to vector<8x8xbf16>
      %c0_28 = arith.constant 0 : index
      %c0_29 = arith.constant 0 : index
      %87 = vector.load %arg6[%c0_28, %c0_29] : memref<8x8xbf16, #tpu.memory_space<vmem>>, vector<8x8xbf16>
      tpu.vector_store %arg6[%c0_28, %c0_29], %86 {strides = array<i32>} : memref<8x8xbf16, #tpu.memory_space<vmem>>, vector<8x8xbf16>,
      %cst_30 = arith.constant 0.000000e+00 : f32
      %c0_31 = arith.constant 0 : index
      %88 = memref.load %arg7[%c0_31] : memref<1xf32, #tpu.memory_space<smem>>
      memref.store %cst_30, %arg7[%c0_31] : memref<1xf32, #tpu.memory_space<smem>>
      %cst_32 = arith.constant 0.000000e+00 : f32
      %89 = vector.broadcast %cst_32 : f32 to vector<1x1xf32>
      %c0_33 = arith.constant 0 : index
      %c0_34 = arith.constant 0 : index
      %90 = vector.load %arg4[%c0_33, %c0_34] : memref<1x1xf32, #tpu.memory_space<vmem>>, vector<1x1xf32>
      tpu.vector_store %arg4[%c0_33, %c0_34], %89 {strides = array<i32>} : memref<1x1xf32, #tpu.memory_space<vmem>>, vector<1x1xf32>,
    } else {
    }
    %c0 = arith.constant 0 : index
    %c0_1 = arith.constant 0 : index
    %3 = vector.load %arg1[%c0, %c0_1] : memref<1x1xf32, #tpu.memory_space<vmem>>, vector<1x1xf32>
    %c0_2 = arith.constant 0 : index
    %c0_3 = arith.constant 0 : index
    %4 = vector.load %arg2[%c0_2, %c0_3] : memref<8x128xf32, #tpu.memory_space<vmem>>, vector<8x128xf32>
    %c0_4 = arith.constant 0 : index
    %c0_5 = arith.constant 0 : index
    %5 = vector.load %arg3[%c0_4, %c0_5] : memref<8x128xbf16, #tpu.memory_space<vmem>>, vector<8x128xbf16>
    %6 = arith.extf %5 : vector<8x128xbf16> to vector<8x128xf32>
    %c0_6 = arith.constant 0 : index
    %c0_7 = arith.constant 0 : index
    %7 = vector.load %arg5[%c0_6, %c0_7] : memref<128x128xbf16, #tpu.memory_space<vmem>>, vector<128x128xbf16>
    %cst = arith.constant dense<0.000000e+00> : vector<8x128xf32>
    %8 = tpu.matmul %5, %7, %cst {dimension_numbers = #tpu.dot_dimension_numbers<[1], [0], [0], [1], [0, 0, 1, 1], [], []>} : vector<8x128xbf16>, vector<128x128xbf16>, vector<8x128xf32> -> vector<8x128xf32>
    %9 = vector.extract_strided_slice %8 {offsets = [0, 127], sizes = [8, 1], strides = [1, 1]} : vector<8x128xf32> to vector<8x1xf32>
    %c0_8 = arith.constant 0 : index
    %c0_9 = arith.constant 0 : index
    %10 = vector.load %arg6[%c0_8, %c0_9] : memref<8x8xbf16, #tpu.memory_space<vmem>>, vector<8x8xbf16>
    %11 = arith.truncf %9 : vector<8x1xf32> to vector<8x1xbf16>
    %cst_10 = arith.constant dense<0.000000e+00> : vector<8x1xf32>
    %12 = tpu.matmul %10, %11, %cst_10 {dimension_numbers = #tpu.dot_dimension_numbers<[1], [0], [0], [1], [0, 0, 1, 1], [], []>} : vector<8x8xbf16>, vector<8x1xbf16>, vector<8x1xf32> -> vector<8x1xf32>
    %c0_11 = arith.constant 0 : index
    %13 = memref.load %arg7[%c0_11] : memref<1xf32, #tpu.memory_space<smem>>
    %14 = vector.broadcast %12 : vector<8x1xf32> to vector<8x128xf32>
    %15 = arith.addf %8, %14 : vector<8x128xf32>
    %16 = vector.broadcast %13 : f32 to vector<8x128xf32>
    %17 = arith.addf %15, %16 : vector<8x128xf32>
    %c1024_i32 = arith.constant 1024 : i32
    %18 = arith.muli %arg0, %c1024_i32 : i32
    %19 = tpu.iota {dimensions = array<i32: 0>} : vector<8x128xi32>
    %c128_i32 = arith.constant 128 : i32
    %20 = vector.broadcast %c128_i32 : i32 to vector<8x128xi32>
    %21 = arith.muli %19, %20 : vector<8x128xi32>
    %22 = vector.broadcast %18 : i32 to vector<8x128xi32>
    %23 = arith.addi %22, %21 : vector<8x128xi32>
    %24 = tpu.iota {dimensions = array<i32: 1>} : vector<8x128xi32>
    %25 = arith.addi %23, %24 : vector<8x128xi32>
    %c1_i32 = arith.constant 1 : i32
    %26 = vector.broadcast %c1_i32 : i32 to vector<8x128xi32>
    %27 = arith.addi %25, %26 : vector<8x128xi32>
    %28 = arith.sitofp %27 : vector<8x128xi32> to vector<8x128xf32>
    %29 = vector.broadcast %3 : vector<1x1xf32> to vector<8x128xf32>
    %30 = arith.addf %29, %28 : vector<8x128xf32>
    %31 = arith.subf %30, %17 : vector<8x128xf32>
    %32 = vector.broadcast %3 : vector<1x1xf32> to vector<8x128xf32>
    %33 = arith.subf %32, %17 : vector<8x128xf32>
    %34 = arith.divf %33, %31 : vector<8x128xf32>
    %cst_12 = arith.constant 1.000000e+00 : f32
    %35 = vector.broadcast %cst_12 : f32 to vector<8x128xf32>
    %36 = arith.subf %35, %34 : vector<8x128xf32>
    %37 = arith.subf %17, %6 : vector<8x128xf32>
    %cst_13 = arith.constant 1.000000e+00 : f32
    %38 = vector.broadcast %cst_13 : f32 to vector<8x128xf32>
    %39 = arith.subf %28, %38 : vector<8x128xf32>
    %40 = vector.broadcast %3 : vector<1x1xf32> to vector<8x128xf32>
    %41 = arith.addf %40, %39 : vector<8x128xf32>
    %42 = arith.subf %41, %37 : vector<8x128xf32>
    %cst_14 = arith.constant 0.000000e+00 : f32
    %43 = vector.broadcast %cst_14 : f32 to vector<8x128xf32>
    %44 = arith.cmpf ogt, %42, %43 : vector<8x128xf32>
    %45 = vector.broadcast %3 : vector<1x1xf32> to vector<8x128xf32>
    %46 = arith.subf %45, %37 : vector<8x128xf32>
    %47 = arith.divf %46, %42 : vector<8x128xf32>
    %cst_15 = arith.constant 1.000000e+00 : f32
    %48 = vector.broadcast %cst_15 : f32 to vector<8x128xf32>
    %49 = arith.subf %48, %47 : vector<8x128xf32>
    %cst_16 = arith.constant 0.000000e+00 : f32
    %50 = vector.broadcast %cst_16 : f32 to vector<8x128xf32>
    %51 = arith.select %44, %49, %50 : vector<8x128xi1>, vector<8x128xf32>
    %52 = arith.subf %36, %51 : vector<8x128xf32>
    %cst_17 = arith.constant 0.000000e+00 : f32
    %53 = vector.broadcast %cst_17 : f32 to vector<8x128xf32>
    %54 = arith.maximumf %4, %53 : vector<8x128xf32>
    %c512_i32 = arith.constant 512 : i32
    %55 = vector.broadcast %c512_i32 : i32 to vector<8x128xi32>
    %56 = arith.cmpi sle, %27, %55 : vector<8x128xi32>
    %cst_18 = arith.constant 0.000000e+00 : f32
    %57 = vector.broadcast %cst_18 : f32 to vector<8x128xf32>
    %58 = arith.select %56, %54, %57 : vector<8x128xi1>, vector<8x128xf32>
    %c0_19 = arith.constant 0 : index
    %c0_20 = arith.constant 0 : index
    %59 = vector.load %arg4[%c0_19, %c0_20] : memref<1x1xf32, #tpu.memory_space<vmem>>, vector<1x1xf32>
    %60 = arith.mulf %58, %52 : vector<8x128xf32>
    %61 = vector.shape_cast %60 : vector<8x128xf32> to vector<1x8x128xf32>
    %cst_21 = arith.constant dense<0.000000e+00> : vector<1xf32>
    %62 = vector.multi_reduction <add>, %61, %cst_21 [1, 2] : vector<1x8x128xf32> to vector<1xf32>
    %63 = vector.shape_cast %62 : vector<1xf32> to vector<1x1x1xf32>
    %64 = vector.extract %63[0, 0, 0] : f32 from vector<1x1x1xf32>
    %65 = vector.broadcast %64 : f32 to vector<1x1xf32>
    %66 = arith.addf %59, %65 : vector<1x1xf32>
    %c0_22 = arith.constant 0 : index
    %c0_23 = arith.constant 0 : index
    %67 = vector.load %arg4[%c0_22, %c0_23] : memref<1x1xf32, #tpu.memory_space<vmem>>, vector<1x1xf32>
    tpu.vector_store %arg4[%c0_22, %c0_23], %66 {strides = array<i32>} : memref<1x1xf32, #tpu.memory_space<vmem>>, vector<1x1xf32>,
    %68 = vector.shape_cast %9 : vector<8x1xf32> to vector<1x8x1xf32>
    %cst_24 = arith.constant dense<0.000000e+00> : vector<1xf32>
    %69 = vector.multi_reduction <add>, %68, %cst_24 [1, 2] : vector<1x8x1xf32> to vector<1xf32>
    %70 = vector.shape_cast %69 : vector<1xf32> to vector<1x1x1xf32>
    %71 = vector.extract %70[0, 0, 0] : f32 from vector<1x1x1xf32>
    %72 = arith.addf %13, %71 : f32
    %c0_25 = arith.constant 0 : index
    %73 = memref.load %arg7[%c0_25] : memref<1xf32, #tpu.memory_space<smem>>
    memref.store %72, %arg7[%c0_25] : memref<1xf32, #tpu.memory_space<smem>>
    return
  }
  func.func @transform_0(%arg0: i32) -> (i32, i32) {
    %c0_i32 = arith.constant 0 : i32
    %c0_i32_0 = arith.constant 0 : i32
    %c0_i32_1 = arith.constant 0 : i32
    return %c0_i32, %c0_i32_0 : i32, i32
  }
  func.func @transform_1(%arg0: i32) -> (i32, i32) {
    %c0_i32 = arith.constant 0 : i32
    %c0_i32_0 = arith.constant 0 : i32
    return %arg0, %c0_i32 : i32, i32
  }
  func.func @transform_2(%arg0: i32) -> (i32, i32) {
    %c0_i32 = arith.constant 0 : i32
    %c0_i32_0 = arith.constant 0 : i32
    return %arg0, %c0_i32 : i32, i32
  }
  func.func @transform_3(%arg0: i32) -> (i32, i32) {
    %c0_i32 = arith.constant 0 : i32
    %c0_i32_0 = arith.constant 0 : i32
    %c0_i32_1 = arith.constant 0 : i32
    return %c0_i32, %c0_i32_0 : i32, i32
  }
}

</mosaic_0001>

<bundles_post_ra>
// kernel: tpu_custom_call.1
= control target key start
LH: loop header
LB: loop body
LE: loop exit
PB: predicated region body
PF: predicated region fallthrough
CT: control target
= control target key end

     0   :  { %s577_s0 = inlined_call_operand.<no memory space> [shape: f32[1,1], index: 0, kind: input, shape index: {}]   ;;  %s578_s1 = inlined_call_operand.hbm [shape: f32[8,128], index: 1, kind: input, shape index: {}]   ;;  %s579_s2 = inlined_call_operand.vmem [shape: bf16[8,128], index: 2, kind: input, shape index: {}]   ;;  %s580_s3 = inlined_call_operand.hbm [shape: f32[1,1], index: 3, kind: output, shape index: {}]  }
   0x1   :  { %v8_v0 = vstv %s577_s0 }
   0x2   :  { %9 = vst [vmem:[#allocation5] sm:$0x1] %v8_v0 }
   0x3   :  { %10 = vsyncpa [#allocation7], 0 }
   0x4   :  { %11 = vsyncpa [#allocation8], 0  ;;  %s465_s14 = smov [#allocation6]   ;;  %s417_s18 = scalar_lea.hbm %s578_s1, 128 }
   0x5   :  { %s20_s15 = sshll.u32 %s465_s14, 4  ;;  %p418_p0 = scmp.ne.s32.totalorder %s578_s1, %s417_s18  ;;  %s21_s15 = int_to_ptr.vmem [resolvable:$true] %s20_s15 }
   0x6   :  { %p421_p1 = scmp.lt.u32.totalorder %s417_s18, %s578_s1 }
   0x8   :  { %p423_p2 = pnand %p421_p1, %p418_p0 }
   0xa   :  { %426 = shalt.err (!%p423_p2)
}
   0xb   :  { %s427_s0 = scalar_lea.vmem %s21_s15, 128  ;;  %p432_p4 = scmp.lt.s32.totalorder %s21_s15, %s21_s15 }
   0xc   :  { %p428_p3 = scmp.ne.s32.totalorder %s21_s15, %s427_s0  ;;  %p433_p5 = scmp.lt.s32.totalorder %s427_s0, %s427_s0 }
   0xe   :  { %p434_p6 = por %p433_p5, %p432_p4 }
  0x10   :  { %p435_p7 = pnand %p434_p6, %p428_p3 }
  0x12   :  { %438 = shalt.err (!%p435_p7)
}
  0x13   :  { %23 = dma.hbm_to_vmem [thread:$0]  %s578_s1, 128, %s21_s15, [#allocation7]   ;;  %v34_v1 = vlaneseq }
  0x14   :  { %461 = dma.done.wait [#allocation7], 128  }
  0x15   :  { %462 = vsyncadd [#allocation7], 4294967168  ;;  %v466_v2 = vmov 0.0   ;;  %vm125_vm0 = vcmask 0   ;;  %v509_v3 = vshrl.u32 %v34_v1, 7  ;;  %v511_v4 = vand.u32 127, %v34_v1 }
  0x16   :  { %376 = vmatprep.subr.bf16.mxu0 %v466_v2  ;;  %396 = vmatprep.subr.bf16.mxu1 %v466_v2  ;;  %126 = vst.msk [vmem:[#allocation9] sm:$0x1] %vm125_vm0, %v466_v2  ;;  %vm467_vm1 = vmmov 0   ;;  %v468_v10 = vmov 1.0|1.0   ;;  %vm121_vm9 = vcmask 60416  }
  0x17   :  { %392 = vmatprep.mubr.msk.bf16.mxu0 %vm467_vm1, %v466_v2  ;;  %398 = vmatprep.mubr.msk.bf16.mxu1 %vm467_vm1, %v466_v2  ;;  %v36_v5 = vadd.s32 8, %v509_v3  ;;  %vm53_vm2 = vcmp.le.s32.totalorder %v509_v3, %v511_v4  ;;  %v37_v6 = vadd.s32 16, %v509_v3  ;;  %v38_v7 = vadd.s32 24, %v509_v3  ;;  %v129_v23 = vld [vmem:[%s579_s2] sm:$0xf]  ;;  %s470_s26 = smov 1  }
  0x18   :  { %v39_v8 = vadd.s32 32, %v509_v3  ;;  %v40_v9 = vadd.s32 40, %v509_v3  ;;  %v41_v11 = vadd.s32 48, %v509_v3  ;;  %vm117_vm8 = vcmp.lt.s32.totalorder %v511_v4, %v509_v3  ;;  %v347_v33 = vld [vmem:[#allocation5] ss:$0 sm:$0xff]  ;;  %v128_v54 = vld [vmem:[#allocation6] sm:$0xff] }
  0x19   :  { %vm54_vm3 = vcmp.le.s32.totalorder %v36_v5, %v511_v4  ;;  %vm55_vm4 = vcmp.le.s32.totalorder %v37_v6, %v511_v4  ;;  %vm56_vm5 = vcmp.le.s32.totalorder %v38_v7, %v511_v4  ;;  %v42_v12 = vadd.s32 56, %v509_v3  ;;  %s471_s2 = smov [#allocation9]  }
  0x1a   :  { %vm349_vm6 = vmpackc.low %vm54_vm3, %vm53_vm2  ;;  %vm57_vm10 = vcmp.le.s32.totalorder %v39_v8, %v511_v4  ;;  %vm58_vm11 = vcmp.le.s32.totalorder %v40_v9, %v511_v4  ;;  %v345_v13 = vsel %vm117_vm8, 1.0, %v466_v2  ;;  %vm59_vm13 = vcmp.le.s32.totalorder %v41_v11, %v511_v4  ;;  %s320_s27 = sshll.u32 %s471_s2, 4  ;;  %s321_s27 = int_to_ptr.vmem [resolvable:$true] %s320_s27 }
  0x1b   :  { %377 = vmatpush3.bf16.msk.msra.mxu0 %vm349_vm6, %v468_v10  ;;  %vm351_vm7 = vmpackc.low %vm56_vm5, %vm55_vm4  ;;  %v120_v14 = vpack.c.bf16 %v345_v13, %v345_v13  ;;  %vm60_vm14 = vcmp.le.s32.totalorder %v42_v12, %v511_v4  ;;  %v43_v15 = vadd.s32 64, %v509_v3  ;;  %v44_v16 = vadd.s32 72, %v509_v3  ;;  %s439_s29 = scalar_lea.vmem %s321_s27, 16  ;;  %s443_s30 = scalar_lea.vmem %s321_s27, 32 }
  0x1c   :  { %378 = vmatprep.subr.bf16.mxu0 %v466_v2  ;;  %vm353_vm12 = vmpackc.low %vm58_vm11, %vm57_vm10  ;;  %v45_v17 = vadd.s32 80, %v509_v3  ;;  %v46_v18 = vadd.s32 88, %v509_v3  ;;  %v47_v19 = vadd.s32 96, %v509_v3  ;;  %v48_v20 = vadd.s32 104, %v509_v3  ;;  %p440_p8 = scmp.ne.s32.totalorder %s321_s27, %s439_s29  ;;  %p444_p9 = scmp.lt.s32.totalorder %s321_s27, %s321_s27 }
  0x1d   :  { %122 = vst.msk [vmem:[#allocation3] sm:$0xf] %vm121_vm9, %v120_v14  ;;  %vm355_vm15 = vmpackc.low %vm60_vm14, %vm59_vm13  ;;  %vm61_vm1 = vcmp.le.s32.totalorder %v43_v15, %v511_v4  ;;  %vm62_vm2 = vcmp.le.s32.totalorder %v44_v16, %v511_v4  ;;  %v49_v21 = vadd.s32 112, %v509_v3  ;;  %v50_v22 = vadd.s32 120, %v509_v3  ;;  %v281_v9 = vld [vmem:[#allocation9] sm:$0x1]  ;;  %p445_p10 = scmp.lt.s32.totalorder %s443_s30, %s439_s29 }
  0x1e   :  { %vm357_vm3 = vmpackc.low %vm62_vm2, %vm61_vm1  ;;  %vm63_vm4 = vcmp.le.s32.totalorder %v45_v17, %v511_v4  ;;  %vm64_vm5 = vcmp.le.s32.totalorder %v46_v18, %v511_v4  ;;  %vm66_vm8 = vcmp.le.s32.totalorder %v48_v20, %v511_v4  ;;  %v469_v24 = vmov 0  }
  0x1f   :  { %379 = vmatpush3.bf16.msk.msra.mxu0 %vm351_vm7, %v468_v10  ;;  %vm359_vm6 = vmpackc.low %vm64_vm5, %vm63_vm4  ;;  %vm65_vm7 = vcmp.le.s32.totalorder %v47_v19, %v511_v4  ;;  %vm67_vm10 = vcmp.le.s32.totalorder %v49_v21, %v511_v4  ;;  %vm68_vm11 = vcmp.le.s32.totalorder %v50_v22, %v511_v4  ;;  %412 = vset.pattern.permute.xlu1 %v469_v24  ;;  %vm188_vm13 = vcmask 1043456   ;;  %p446_p11 = por %p445_p10, %p444_p9 }
  0x20   :  { %380 = vmatprep.subr.bf16.mxu0 %v466_v2  ;;  %vm361_vm9 = vmpackc.low %vm66_vm8, %vm65_vm7  ;;  %411 = vset.pattern.permute.xlu0 %v469_v24  ;;  %vm184_vm14 = vcmask 64512   ;;  %v244_v38 = vmul.u32 128, %v509_v3  ;;  %v130_v44 = vunpack.c.l.bf16 %v129_v23  ;;  %v278_v59 = vmax.f32 %v128_v54, 0.0 }
  0x21   :  { %258 = vperm.xlu1 %412, %v347_v33   ;;  %p447_p12 = pnand %p446_p11, %p440_p8 }
  0x22   :  { %v249_v39 = vadd.s32 %v244_v38, %v511_v4 }
  0x23   :  { %381 = vmatpush3.bf16.msk.msra.mxu0 %vm353_vm12, %v468_v10  ;;  %vm363_vm12 = vmpackc.low %vm68_vm11, %vm67_vm10 }
  0x24   :  { %382 = vmatprep.subr.bf16.mxu0 %v466_v2  ;;  %v179_v32 = vld [vmem:[#allocation3] sm:$0xf]  ;;  %v250_v40 = vadd.s32 1, %v249_v39 }
  0x26   :  { %v251_v41 = vcvt.s32.f32 %v250_v40 }
  0x27   :  { %383 = vmatpush3.bf16.msk.msra.mxu0 %vm355_vm15, %v468_v10  ;;  %vm279_vm15 = vcmp.le.s32.totalorder %v250_v40, 512 }
  0x28   :  { %384 = vmatprep.subr.bf16.mxu0 %v466_v2  ;;  %v348_v43 = vadd.f32 -1.0, %v251_v41  ;;  %v280_v63 = vsel %vm279_vm15, %v278_v59, 0.0 }
  0x2b   :  { %385 = vmatpush3.bf16.msk.msra.mxu0 %vm357_vm3, %v468_v10 }
  0x2c   :  { %386 = vmatprep.subr.bf16.mxu0 %v466_v2 }
  0x2f   :  { %387 = vmatpush3.bf16.msk.msra.mxu0 %vm359_vm6, %v468_v10 }
  0x30   :  { %388 = vmatprep.subr.bf16.mxu0 %v466_v2 }
  0x33   :  { %389 = vmatpush3.bf16.msk.msra.mxu0 %vm361_vm9, %v468_v10 }
  0x34   :  { %390 = vmatprep.subr.bf16.mxu0 %v466_v2 }
  0x37   :  { %391 = vmatpush3.bf16.msk.msra.mxu0 %vm363_vm12, %v468_v10 }
  0x3a   :  { %393 = vmatmul.mubr.bf16.vlgmr.msra.gmra.mrb[0].mxu0 %v129_v23 }
  0xa0   :  { %v259_v42 = vpop.permute.xlu1 %258 }
  0xa1   :  { %v261_v45 = vadd.f32 %v259_v42, %v251_v41  ;;  %v269_v48 = vadd.f32 %v348_v43, %v259_v42 }
 0x10d   :  { %v173_v25 = vpop.f32.mrb[0].mxu0 }
 0x10e   :  { %v394_v26 = vpop.f32.mrb[1].mxu0  ;;  %v180_v27 = vpack.c.bf16 %v173_v25, %v173_v25 }
 0x10f   :  { %v176_v28 = vpop.f32.mrb[2].mxu0 }
 0x110   :  { %182 = vrot.lane.b32.xlu0 %v180_v27, %s470_s26  ;;  %v395_v29 = vpop.f32.mrb[3].mxu0 }
 0x182   :  { %v183_v30 = vpop.permute.xlu0 %182 }
 0x183   :  { %v190_v31 = vsel %vm188_vm13, %v183_v30, 0 }
 0x184   :  { %397 = vmatpush3.bf16.msra.mxu1 %v190_v31 }
 0x187   :  { %399 = vmatmul.mubr.msk.bf16.vlgmr.msra.gmra.mrb[0].mxu1 %vm184_vm14, %v179_v32 }
 0x25a   :  { %v226_v34 = vpop.f32.mrb[0].mxu1 }
 0x25b   :  { %235 = vperm.xlu0 %411, %v226_v34   ;;  %v400_v35 = vpop.f32.mrb[1].mxu1 }
 0x25c   :  { %v229_v36 = vpop.f32.mrb[2].mxu1 }
 0x25d   :  { %v401_v37 = vpop.f32.mrb[3].mxu1 }
 0x2da   :  { %v236_v46 = vpop.permute.xlu0 %235 }
 0x2db   :  { %v238_v47 = vadd.f32 %v236_v46, %v173_v25 }
 0x2dd   :  { %v262_v49 = vsub.f32 %v261_v45, %v238_v47  ;;  %v267_v50 = vsub.f32 %v238_v47, %v130_v44  ;;  %v263_v53 = vsub.f32 %v259_v42, %v238_v47 }
 0x2df   :  { %413 = vrcp.f32 %v262_v49  ;;  %v270_v51 = vsub.f32 %v269_v48, %v267_v50  ;;  %v272_v55 = vsub.f32 %v259_v42, %v267_v50 }
 0x2e1   :  { %415 = vrcp.f32 %v270_v51  ;;  %vm271_vm1 = vcmp.gt.f32.partialorder %v270_v51, 0.0 }
 0x2e9   :  { %v414_v52 = vpop.eup %413 }
 0x2ea   :  { %v265_v57 = vmul.f32 %v414_v52, %v263_v53 }
 0x2eb   :  { %v416_v56 = vpop.eup %415 }
 0x2ec   :  { %v274_v58 = vmul.f32 %v416_v56, %v272_v55  ;;  %v266_v61 = vsub.f32 1.0, %v265_v57 }
 0x2ee   :  { %v275_v60 = vsub.f32 1.0, %v274_v58 }
 0x2f0   :  { %v276_v62 = vsel %vm271_vm1, %v275_v60, 0.0 }
 0x2f1   :  { %v277_v0 = vsub.f32 %v266_v61, %v276_v62 }
 0x2f3   :  { %v282_v1 = vmul.f32 %v280_v63, %v277_v0 }
 0x2f5   :  { %283 = vadd.xlane.f32.xlu1 %v282_v1 }
 0x382   :  { %v284_v2 = vpop.xlane.xlu1 %283 }
 0x383   :  { %v285_v3 = vrot.slane %v284_v2, 4 }
 0x385   :  { %v286_v4 = vadd.f32 %v285_v3, %v284_v2 }
 0x387   :  { %v287_v5 = vrot.slane %v286_v4, 2 }
 0x389   :  { %v288_v6 = vadd.f32 %v287_v5, %v286_v4 }
 0x38b   :  { %v289_v7 = vrot.slane %v288_v6, 1 }
 0x38d   :  { %v290_v8 = vadd.f32 %v289_v7, %v288_v6 }
 0x38f   :  { %402 = vpush %v290_v8 }
 0x3c0   :  { %s403_s28 = spop %402 }
 0x3c1   :  { %v292_v10 = vstv %s403_s28 }
 0x3c2   :  { %v293_v11 = vadd.f32 %v292_v10, %v281_v9 }
 0x3c4   :  { %295 = vst.msk [vmem:[#allocation9] sm:$0x1] %vm125_vm0, %v293_v11 }
 0x3c5   :  { %450 = shalt.err (!%p447_p12)
}
 0x3c6   :  { %s451_s6 = scalar_lea.hbm %s580_s3, 16 }
 0x3c7   :  { %p452_p13 = scmp.ne.s32.totalorder %s580_s3, %s451_s6  ;;  %p455_p0 = scmp.lt.u32.totalorder %s451_s6, %s580_s3 }
 0x3c9   :  { %p457_p1 = pnand %p455_p0, %p452_p13 }
 0x3cb   :  { %460 = shalt.err (!%p457_p1)
}
 0x3cc   :  { %323 = dma.vmem_to_hbm [thread:$0]  %s321_s27, 16, %s580_s3, [#allocation8]  }
 0x3cd   :  { %463 = dma.done.wait [#allocation8], 16  }
 0x3ce   :  { %464 = vsyncadd [#allocation8], 4294967280 }
 0x3cf   :  { %327 = vsyncpa [#allocation7], 1 }
 0x3d0   :  { %328 = vsyncpa [#allocation8], 1 }

</bundles_post_ra>
